<compile_context>
chip_gen: v5e
topology: v5e:2x2
jax: 0.10.0
libtpu: 0.0.40
codegen_flags: <defaults>
</compile_context>

<pallas_src>
import functools

import jax
import jax.numpy as jnp
from jax.experimental import pallas as pl
from jax.experimental.pallas import tpu as pltpu


def _round_up(x, m):
    return (x + m - 1) // m * m


def _focal_loss_kernel(pred_ref, tgt_ref, out_ref, *, gamma, reduction, batch):
    tb = pred_ref.shape[0]

    logits = pred_ref[...].astype(jnp.float32)                 # (TB, C)
    tgt = tgt_ref[...]                                          # (TB, 1) int32

    # Numerically stable log-softmax pieces (no full logp tile materialized).
    m = jnp.max(logits, axis=-1, keepdims=True)                 # (TB, 1)
    shifted = logits - m                                        # (TB, C)
    lse = jnp.log(jnp.sum(jnp.exp(shifted), axis=-1, keepdims=True))  # (TB, 1)

    # Gather the target-class shifted logit via where-select (no dynamic
    # gather on TPU; avoids onehot int->float convert + full-tile multiply).
    col = jax.lax.broadcasted_iota(jnp.int32, logits.shape, 1)
    tgt_shift = jnp.sum(jnp.where(col == tgt, shifted, 0.0),
                        axis=-1, keepdims=True)                 # (TB, 1)

    logpt = tgt_shift - lse                                     # (TB, 1)
    ce = -logpt                                                 # per-row CE
    pt = jnp.exp(logpt)
    w = 1.0 - pt

    g = float(gamma)
    if g.is_integer() and 0 <= g <= 16:
        gi = int(g)
        if gi == 0:
            w_pow = jnp.ones_like(w)
        else:
            w_pow = w
            for _ in range(gi - 1):
                w_pow = w_pow * w                               # VPU only
    else:
        w_pow = jnp.power(w, jnp.float32(g))

    focal = w_pow * ce                                          # (TB, 1)

    if reduction == "none":
        # TODO(synk): a lane-dense (1, TB) output layout would avoid masked
        # column stores; kept (TB, 1) for guaranteed lowering (output traffic
        # is only ~1/C of input traffic).
        out_ref[...] = focal
    else:
        # Mask padded rows of the (possibly ragged) last tile, then write a
        # per-tile partial sum into lane 0 of a lane-dense (1, 128) block.
        row = (jax.lax.broadcasted_iota(jnp.int32, (tb, 1), 0)
               + pl.program_id(0) * tb)
        focal = jnp.where(row < batch, focal, 0.0)
        tile_sum = jnp.sum(focal)
        lane = jax.lax.broadcasted_iota(jnp.int32, (1, 128), 1)
        out_ref[...] = jnp.where(lane == 0, tile_sum, 0.0)


def focal_loss(predicted, target, *, gamma=2.0, reduction="mean"):
    """predicted: [B, C] float; target: [B] int. Returns scalar or [B] f32."""
    B, C = predicted.shape
    itemsize = jnp.dtype(predicted.dtype).itemsize
    target = target.astype(jnp.int32).reshape(B, 1)

    # Batch tile: multiple of the dtype's sublane packing, logits block
    # capped at ~4 MiB (double-buffered ~8 MiB -> fits every gen's VMEM).
    sublane = {4: 8, 2: 16, 1: 32}.get(itemsize, 8)
    max_block_bytes = 4 * 1024 * 1024
    tb = (max_block_bytes // max(1, C * itemsize)) // sublane * sublane
    tb = max(sublane, min(1024, tb))
    tb = min(tb, _round_up(B, sublane))
    b_pad = _round_up(B, tb)
    num_tiles = b_pad // tb
    # TODO(synk): for vocabulary-sized C, also tile the class dim with an
    # online-softmax accumulation; here each tile holds the full class axis.

    if b_pad != B:
        predicted = jnp.pad(predicted, ((0, b_pad - B), (0, 0)))
        target = jnp.pad(target, ((0, b_pad - B), (0, 0)))

    if reduction == "none":
        out_shape = jax.ShapeDtypeStruct((b_pad, 1), jnp.float32)
        out_spec = pl.BlockSpec((tb, 1), lambda i: (i, 0))
    else:
        out_shape = jax.ShapeDtypeStruct((1, 128 * num_tiles), jnp.float32)
        out_spec = pl.BlockSpec((1, 128), lambda i: (0, i))

    kernel = functools.partial(
        _focal_loss_kernel, gamma=float(gamma), reduction=reduction, batch=B
    )

    out = pl.pallas_call(
        kernel,
        out_shape=out_shape,
        grid_spec=pltpu.PrefetchScalarGridSpec(
            num_scalar_prefetch=0,
            grid=(num_tiles,),
            in_specs=[
                pl.BlockSpec((tb, C), lambda i: (i, 0)),
                pl.BlockSpec((tb, 1), lambda i: (i, 0)),
            ],
            out_specs=out_spec,
        ),
        compiler_params=pltpu.CompilerParams(
            dimension_semantics=("parallel",),
            vmem_limit_bytes=32 * 1024 * 1024,
        ),
    )(predicted, target)

    if reduction == "none":
        return out[:B, 0]
    total = jnp.sum(out)
    if reduction == "mean":
        return total / jnp.float32(B)
    return total


def _reference_focal_loss(predicted, target, gamma=2.0, reduction="mean"):
    logp = jax.nn.log_softmax(predicted.astype(jnp.float32), axis=-1)
    logpt = jnp.take_along_axis(logp, target[:, None], axis=-1)[:, 0]
    ce = -logpt
    pt = jnp.exp(logpt)
    focal = (1.0 - pt) ** gamma * ce
    if reduction == "none":
        return focal
    if reduction == "mean":
        return focal.mean()
    return focal.sum()


if __name__ == "__main__":
    key = jax.random.PRNGKey(0)
    k1, k2 = jax.random.split(key)

    # Small shapes consistent with the module: [batch_size, n_classes].
    B, C = 8, 16
    predicted = jax.random.normal(k1, (B, C), dtype=jnp.float32)
    target = jax.random.randint(k2, (B,), 0, C, dtype=jnp.int32)

    out = focal_loss(predicted, target, gamma=2.0, reduction="mean")
    out = jax.block_until_ready(out)
    ref = _reference_focal_loss(predicted, target, 2.0, "mean")
    assert jnp.allclose(out, ref, atol=1e-5, rtol=1e-5), (out, ref)

    # Other reductions on the same small case.
    for red in ("none", "sum"):
        o = jax.block_until_ready(
            focal_loss(predicted, target, gamma=2.0, reduction=red))
        r = _reference_focal_loss(predicted, target, 2.0, red)
        assert jnp.allclose(o, r, atol=1e-5, rtol=1e-5), (red, o, r)

    # Multi-tile + ragged last tile (exercises padding mask & partial sums).
    k3, k4 = jax.random.split(k2)
    B2, C2 = 1337, 24
    p2 = jax.random.normal(k3, (B2, C2), dtype=jnp.float32)
    t2 = jax.random.randint(k4, (B2,), 0, C2, dtype=jnp.int32)
    o2 = jax.block_until_ready(focal_loss(p2, t2, gamma=2.0, reduction="mean"))
    r2 = _reference_focal_loss(p2, t2, 2.0, "mean")
    assert jnp.allclose(o2, r2, atol=1e-4, rtol=1e-4), (o2, r2)

    # bf16 logits go to the kernel un-upcast (native-dtype DMA path).
    p3 = p2.astype(jnp.bfloat16)
    o3 = jax.block_until_ready(focal_loss(p3, t2, gamma=2.0, reduction="mean"))
    r3 = _reference_focal_loss(p3, t2, 2.0, "mean")
    assert jnp.allclose(o3, r3, atol=1e-3, rtol=1e-3), (o3, r3)

    print("KERNEL_OK")
</pallas_src>

<mosaic_0001>
module attributes {stable_mosaic.version = 11 : i64} {
  func.func @_focal_loss_kernel(%arg0: i32, %arg1: memref<8x16xf32, #tpu.memory_space<vmem>>, %arg2: memref<8x1xi32, #tpu.memory_space<vmem>>, %arg3: memref<1x128xf32, #tpu.memory_space<vmem>>) attributes {dimension_semantics = [#tpu.dimension_semantics<parallel>], iteration_bounds = array<i64: 1>, scalar_prefetch = 0 : i64, scratch_operands = 0 : i64, tpu.core_type = #tpu.core_type<tc>, window_params = [{transform_indices = @transform_0, window_bounds = array<i64: 8, 16>}, {transform_indices = @transform_1, window_bounds = array<i64: 8, 1>}, {transform_indices = @transform_2, window_bounds = array<i64: 1, 128>}]} {
    %c0 = arith.constant 0 : index
    %c0_0 = arith.constant 0 : index
    %0 = vector.load %arg1[%c0, %c0_0] : memref<8x16xf32, #tpu.memory_space<vmem>>, vector<8x16xf32>
    %c0_1 = arith.constant 0 : index
    %c0_2 = arith.constant 0 : index
    %1 = vector.load %arg2[%c0_1, %c0_2] : memref<8x1xi32, #tpu.memory_space<vmem>>, vector<8x1xi32>
    %cst = arith.constant dense<0xFF800000> : vector<8xf32>
    %2 = vector.multi_reduction <maximumf>, %0, %cst [1] : vector<8x16xf32> to vector<8xf32>
    %3 = vector.shape_cast %2 : vector<8xf32> to vector<8x1xf32>
    %4 = vector.broadcast %3 : vector<8x1xf32> to vector<8x16xf32>
    %5 = arith.subf %0, %4 : vector<8x16xf32>
    %6 = math.exp %5 : vector<8x16xf32>
    %cst_3 = arith.constant dense<0.000000e+00> : vector<8xf32>
    %7 = vector.multi_reduction <add>, %6, %cst_3 [1] : vector<8x16xf32> to vector<8xf32>
    %8 = vector.shape_cast %7 : vector<8xf32> to vector<8x1xf32>
    %9 = math.log %8 : vector<8x1xf32>
    %10 = tpu.iota {dimensions = array<i32: 1>} : vector<8x16xi32>
    %11 = vector.broadcast %1 : vector<8x1xi32> to vector<8x16xi32>
    %12 = arith.cmpi eq, %10, %11 : vector<8x16xi32>
    %cst_4 = arith.constant 0.000000e+00 : f32
    %13 = vector.broadcast %cst_4 : f32 to vector<8x16xf32>
    %14 = arith.select %12, %5, %13 : vector<8x16xi1>, vector<8x16xf32>
    %cst_5 = arith.constant dense<0.000000e+00> : vector<8xf32>
    %15 = vector.multi_reduction <add>, %14, %cst_5 [1] : vector<8x16xf32> to vector<8xf32>
    %16 = vector.shape_cast %15 : vector<8xf32> to vector<8x1xf32>
    %17 = arith.subf %16, %9 : vector<8x1xf32>
    %cst_6 = arith.constant 0.000000e+00 : f32
    %18 = vector.broadcast %cst_6 : f32 to vector<8x1xf32>
    %19 = arith.subf %18, %17 : vector<8x1xf32>
    %20 = math.exp %17 : vector<8x1xf32>
    %cst_7 = arith.constant 1.000000e+00 : f32
    %21 = vector.broadcast %cst_7 : f32 to vector<8x1xf32>
    %22 = arith.subf %21, %20 : vector<8x1xf32>
    %23 = arith.mulf %22, %22 : vector<8x1xf32>
    %24 = arith.mulf %23, %19 : vector<8x1xf32>
    %25 = tpu.iota {dimensions = array<i32: 0>} : vector<8x1xi32>
    %c8_i32 = arith.constant 8 : i32
    %26 = arith.muli %arg0, %c8_i32 : i32
    %27 = vector.broadcast %26 : i32 to vector<8x1xi32>
    %28 = arith.addi %25, %27 : vector<8x1xi32>
    %c8_i32_8 = arith.constant 8 : i32
    %29 = vector.broadcast %c8_i32_8 : i32 to vector<8x1xi32>
    %30 = arith.cmpi slt, %28, %29 : vector<8x1xi32>
    %cst_9 = arith.constant 0.000000e+00 : f32
    %31 = vector.broadcast %cst_9 : f32 to vector<8x1xf32>
    %32 = arith.select %30, %24, %31 : vector<8x1xi1>, vector<8x1xf32>
    %33 = vector.shape_cast %32 : vector<8x1xf32> to vector<1x8x1xf32>
    %cst_10 = arith.constant dense<0.000000e+00> : vector<1xf32>
    %34 = vector.multi_reduction <add>, %33, %cst_10 [1, 2] : vector<1x8x1xf32> to vector<1xf32>
    %35 = vector.shape_cast %34 : vector<1xf32> to vector<1x1x1xf32>
    %36 = vector.extract %35[0, 0, 0] : f32 from vector<1x1x1xf32>
    %37 = tpu.iota {dimensions = array<i32: 1>} : vector<1x128xi32>
    %c0_i32 = arith.constant 0 : i32
    %38 = vector.broadcast %c0_i32 : i32 to vector<1x128xi32>
    %39 = arith.cmpi eq, %37, %38 : vector<1x128xi32>
    %cst_11 = arith.constant 0.000000e+00 : f32
    %40 = vector.broadcast %36 : f32 to vector<1x128xf32>
    %41 = vector.broadcast %cst_11 : f32 to vector<1x128xf32>
    %42 = arith.select %39, %40, %41 : vector<1x128xi1>, vector<1x128xf32>
    %c0_12 = arith.constant 0 : index
    %c0_13 = arith.constant 0 : index
    %43 = vector.load %arg3[%c0_12, %c0_13] : memref<1x128xf32, #tpu.memory_space<vmem>>, vector<1x128xf32>
    tpu.vector_store %arg3[%c0_12, %c0_13], %42 {strides = array<i32>} : memref<1x128xf32, #tpu.memory_space<vmem>>, vector<1x128xf32>,
    return
  }
  func.func @transform_0(%arg0: i32) -> (i32, i32) {
    %c0_i32 = arith.constant 0 : i32
    %c0_i32_0 = arith.constant 0 : i32
    return %arg0, %c0_i32 : i32, i32
  }
  func.func @transform_1(%arg0: i32) -> (i32, i32) {
    %c0_i32 = arith.constant 0 : i32
    %c0_i32_0 = arith.constant 0 : i32
    return %arg0, %c0_i32 : i32, i32
  }
  func.func @transform_2(%arg0: i32) -> (i32, i32) {
    %c0_i32 = arith.constant 0 : i32
    %c0_i32_0 = arith.constant 0 : i32
    return %c0_i32, %arg0 : i32, i32
  }
}

</mosaic_0001>

<bundles_post_ra>
// kernel: tpu_custom_call.1
= control target key start
LH: loop header
LB: loop body
LE: loop exit
PB: predicated region body
PF: predicated region fallthrough
CT: control target
= control target key end

     0   :  { %vm14_vm0 = vcmask 130048   ;;  %s147_s0 = inlined_call_operand.vmem [shape: f32[8,16], index: 0, kind: input, shape index: {}]   ;;  %s148_s1 = inlined_call_operand.vmem [shape: s32[8,1], index: 1, kind: input, shape index: {}]   ;;  %s149_s2 = inlined_call_operand.hbm [shape: f32[1,128], index: 2, kind: output, shape index: {}]  }
   0x1   :  { %v12_v0 = vld [vmem:[%s147_s0] sm:$0xff] }
   0x2   :  { %7 = vsyncpa [#allocation3], 0  ;;  %v15_v1 = vsel %vm14_vm0, %v12_v0, -inf  ;;  %v118_v2 = vmov 0   ;;  %v13_v3 = vld [vmem:[%s148_s1] sm:$0xff]  ;;  %v26_v9 = vlaneseq  ;;  %vm50_vm2 = vcmask 7168  }
   0x3   :  { %85 = vset.pattern.permute.xlu0 %v118_v2  ;;  %s119_s0 = smov [#allocation2]   ;;  %s72_s15 = sshll.u32 %s149_s2, 4  ;;  %s73_s15 = int_to_ptr.hbm [resolvable:$true] %s72_s15 }
   0x4   :  { %16 = vmax.xlane.f32.xlu0 %v15_v1  ;;  %v27_v10 = vand.u32 127, %v26_v9  ;;  %s70_s1 = sshll.u32 %s119_s0, 4  ;;  %s71_s1 = int_to_ptr.vmem [resolvable:$true] %s70_s1 }
   0x6   :  { %vm61_vm3 = vcmp.eq.s32.totalorder %v27_v10, 0 }
  0x18   :  { %29 = vperm.xlu0 %85, %v13_v3  }
  0x77   :  { %v17_v4 = vpop.xlane.xlu0 %16 }
  0x78   :  { %v18_v5 = vsub.f32 %v12_v0, %v17_v4 }
  0x7a   :  { %v19_v6 = vmul.f32 1.442695, %v18_v5 }
  0x7c   :  { %86 = vpow2.f32 %v19_v6 }
  0x82   :  { %v87_v7 = vpop.eup %86 }
  0x83   :  { %v21_v8 = vsel %vm14_vm0, %v87_v7, 0.0 }
  0x84   :  { %22 = vadd.xlane.f32.xlu1 %v21_v8 }
  0x8a   :  { %v30_v11 = vpop.permute.xlu0 %29 }
  0x8b   :  { %vm31_vm1 = vcmp.eq.s32.totalorder %v27_v10, %v30_v11 }
  0x8c   :  { %v32_v12 = vsel %vm31_vm1, %v18_v5, 0.0 }
  0x8d   :  { %v33_v13 = vsel %vm14_vm0, %v32_v12, 0.0 }
  0x8e   :  { %34 = vadd.xlane.f32.xlu1 %v33_v13 }
  0xf7   :  { %v23_v14 = vpop.xlane.xlu1 %22 }
  0xf8   :  { %88 = vlog2.f32 %v23_v14 }
  0xfe   :  { %v89_v15 = vpop.eup %88 }
  0xff   :  { %v25_v16 = vmul.f32 0.6931472, %v89_v15 }
 0x101   :  { %v35_v17 = vpop.xlane.xlu1 %34 }
 0x102   :  { %v36_v18 = vsub.f32 %v35_v17, %v25_v16 }
 0x104   :  { %v38_v19 = vmul.f32 1.442695, %v36_v18  ;;  %v37_v22 = vsub.f32 0.0, %v36_v18 }
 0x106   :  { %90 = vpow2.f32 %v38_v19 }
 0x10c   :  { %v91_v20 = vpop.eup %90 }
 0x10d   :  { %v40_v21 = vsub.f32 1.0, %v91_v20 }
 0x10f   :  { %v41_v23 = vmul.f32 %v40_v21, %v40_v21 }
 0x111   :  { %v42_v24 = vmul.f32 %v41_v23, %v37_v22 }
 0x113   :  { %v51_v25 = vsel %vm50_vm2, %v42_v24, 0.0 }
 0x114   :  { %52 = vadd.xlane.f32.xlu2 %v51_v25 }
 0x187   :  { %v53_v26 = vpop.xlane.xlu2 %52 }
 0x188   :  { %v54_v27 = vrot.slane %v53_v26, 4 }
 0x18a   :  { %v55_v28 = vadd.f32 %v54_v27, %v53_v26 }
 0x18c   :  { %v56_v29 = vrot.slane %v55_v28, 2 }
 0x18e   :  { %v57_v30 = vadd.f32 %v56_v29, %v55_v28 }
 0x190   :  { %v58_v31 = vrot.slane %v57_v30, 1 }
 0x192   :  { %v59_v32 = vadd.f32 %v58_v31, %v57_v30 }
 0x194   :  { %81 = vpush %v59_v32 }
 0x1c5   :  { %s82_s16 = spop %81 }
 0x1c6   :  { %v62_v33 = vstv %s82_s16 }
 0x1c7   :  { %v63_v34 = vsel %vm61_vm3, %v62_v33, 0.0 }
 0x1c8   :  { %64 = vst [vmem:[#allocation2] sm:$0x1] %v63_v34 }
 0x1c9   :  { %75 = dma.vmem_to_hbm [thread:$0]  %s71_s1, 16, %s73_s15, [#allocation3]  }
 0x1ca   :  { %116 = dma.done.wait [#allocation3], 16  }
 0x1cb   :  { %117 = vsyncadd [#allocation3], 4294967280 }
 0x1cc   :  { %80 = vsyncpa [#allocation3], 1 }

</bundles_post_ra>
